<compile_context>
chip_gen: v6e
topology: v6e:2x2x1
jax: 0.10.0
libtpu: 0.0.40
codegen_flags: <defaults>
</compile_context>

<pallas_src>
import functools

import jax
import jax.numpy as jnp
import numpy as np
from jax import lax
from jax.experimental import pallas as pl
from jax.experimental.pallas import tpu as pltpu

_NEG_INF = -1e30

POOLING_MODES = ('avg', 'max', 'first', 'last', 'attn', 'attn_k', 'attn_v', 'attn_kv')


# ------------------------------------------------------------ tile helpers --

def _largest_divisor(n, cap, mult=1):
    """Largest divisor of n that is <= cap, preferring multiples of `mult`."""
    cap = int(max(1, min(cap, n)))
    for d in range(cap, 0, -1):
        if n % d == 0 and d % mult == 0:
            return d
    for d in range(cap, 0, -1):
        if n % d == 0:
            return d
    return n


def _choose_tiles(B, S, H, itemsize=4, x_block_budget=4 * 1024 * 1024):
    """Pick (batch_tile, seq_tile) so a double-buffered x block stays well
    inside scoped VMEM on every chip (v5e 16 MiB, v6e 32 MiB, v7x 32 MiB)."""
    bt = _largest_divisor(B, 8)
    st_cap = max(8, x_block_budget // max(1, bt * H * itemsize))
    st = _largest_divisor(S, st_cap, mult=8)
    return bt, st


def _compiler_params(semantics):
    return pltpu.CompilerParams(dimension_semantics=semantics,
                                vmem_limit_bytes=32 * 1024 * 1024)


# ---------------------------------------------------------------- kernels ---

def _avg_kernel(x_ref, m_ref, o_ref, sum_ref, cnt_ref):
    s_idx = pl.program_id(1)

    @pl.when(s_idx == 0)
    def _():
        sum_ref[...] = jnp.zeros_like(sum_ref)
        cnt_ref[...] = jnp.zeros_like(cnt_ref)

    x = x_ref[...]                                     # (bt, st, H)
    m = m_ref[...]                                     # (bt, st, 1)
    sum_ref[...] += jnp.sum(x * m, axis=1)             # (bt, H)
    cnt_ref[...] += jnp.sum(m, axis=1)                 # (bt, 1)

    @pl.when(s_idx == pl.num_programs(1) - 1)
    def _():
        o_ref[...] = (sum_ref[...] /
                      jnp.maximum(cnt_ref[...], 1e-13)).astype(o_ref.dtype)


def _max_kernel(x_ref, m_ref, o_ref, acc_ref):
    s_idx = pl.program_id(1)

    @pl.when(s_idx == 0)
    def _():
        acc_ref[...] = jnp.full_like(acc_ref, _NEG_INF)

    x = x_ref[...]                                     # (bt, st, H)
    m = m_ref[...]                                     # (bt, st, 1)
    acc_ref[...] = jnp.maximum(
        acc_ref[...], jnp.max(jnp.where(m > 0, x, _NEG_INF), axis=1))

    @pl.when(s_idx == pl.num_programs(1) - 1)
    def _():
        o_ref[...] = acc_ref[...].astype(o_ref.dtype)


def _first_kernel(x_ref, o_ref):
    # x_ref is the (bt, 1, H) slice containing only sequence position 0.
    o_ref[...] = x_ref[...][:, 0, :]


def _last_kernel(lp_ref, x_ref, o_ref):
    # The gather already happened in the index_map using the scalar-prefetched
    # last positions; x_ref is the single (1, 1, H) row we need.
    del lp_ref
    o_ref[...] = x_ref[...][:, 0, :]


def _attn_kernel(*refs, use_v):
    if use_v:
        x_ref, m_ref, q_ref, wv_ref, bv_ref, o_ref, m_sc, l_sc, acc_sc = refs
    else:
        x_ref, m_ref, q_ref, o_ref, m_sc, l_sc, acc_sc = refs

    s_idx = pl.program_id(1)

    @pl.when(s_idx == 0)
    def _():
        m_sc[...] = jnp.full_like(m_sc, -jnp.inf)
        l_sc[...] = jnp.zeros_like(l_sc)
        acc_sc[...] = jnp.zeros_like(acc_sc)

    x = x_ref[...]                                     # (bt, st, H)
    m = m_ref[...]                                     # (bt, st, 1)
    q = q_ref[...]                                     # (1, H) fused query

    # Fused scores: K projection folded into q (bias cancels in softmax).
    s = jnp.sum(x * q[None, :, :], axis=-1, keepdims=True)     # (bt, st, 1)
    s = jnp.where(m > 0, s, _NEG_INF)

    # Online softmax across sequence tiles.
    m_new = jnp.maximum(m_sc[...], jnp.max(s, axis=1))          # (bt, 1)
    alpha = jnp.exp(m_sc[...] - m_new)                          # (bt, 1)
    p = jnp.exp(s - m_new[:, None, :])                          # (bt, st, 1)
    l_sc[...] = alpha * l_sc[...] + jnp.sum(p, axis=1)          # (bt, 1)
    acc_sc[...] = alpha * acc_sc[...] + jnp.sum(p * x, axis=1)  # (bt, H)
    m_sc[...] = m_new

    @pl.when(s_idx == pl.num_programs(1) - 1)
    def _():
        pooled = acc_sc[...] / l_sc[...]                        # (bt, H)
        if use_v:
            # V projection applied after pooling (softmax weights sum to 1).
            # Consumes Wv in PyTorch (out, in) layout directly: pooled @ Wv^T.
            pooled = lax.dot_general(
                pooled, wv_ref[...],
                dimension_numbers=(((1,), (1,)), ((), ())),
                preferred_element_type=jnp.float32) + bv_ref[...]
        o_ref[...] = pooled.astype(o_ref.dtype)


# ---------------------------------------------------------------- wrapper ---

def pooler_forward(mode, tensor, mask=None, params=None):
    """Pallas implementation of Pooler.forward.

    tensor: (B, S, H) float32; mask: (B, S) float (1 keep / 0 pad) or None.
    Returns (B, H) float32.
    """
    assert mode in POOLING_MODES
    B, S, H = tensor.shape
    out_shape = jax.ShapeDtypeStruct((B, H), tensor.dtype)

    # ------------------------------------------------------------- first ---
    if mode == 'first':
        # TODO(synk): the module's `assert mask[:, 0].all()` is a host-side
        # check; it is not re-checked inside the kernel.
        bt = _largest_divisor(B, 8)
        return pl.pallas_call(
            _first_kernel,
            out_shape=out_shape,
            grid_spec=pltpu.PrefetchScalarGridSpec(
                num_scalar_prefetch=0,
                grid=(B // bt,),
                in_specs=[pl.BlockSpec((bt, 1, H), lambda b: (b, 0, 0))],
                out_specs=pl.BlockSpec((bt, H), lambda b: (b, 0))),
            compiler_params=_compiler_params(("parallel",)),
        )(tensor)

    # -------------------------------------------------------------- last ---
    if mode == 'last':
        if mask is None:
            last_pos = jnp.full((B,), S - 1, dtype=jnp.int32)
        else:
            # module semantics: last_pos = mask.sum(-1) - 1; `% S` reproduces
            # PyTorch's wrap-around (index -1 -> S-1) for all-padding rows.
            last_pos = (jnp.sum(mask, axis=-1).astype(jnp.int32) - 1) % S
        return pl.pallas_call(
            _last_kernel,
            out_shape=out_shape,
            grid_spec=pltpu.PrefetchScalarGridSpec(
                num_scalar_prefetch=1,
                grid=(B,),
                in_specs=[pl.BlockSpec((1, 1, H),
                                       lambda b, lp: (b, lp[b], 0))],
                out_specs=pl.BlockSpec((1, H), lambda b, lp: (b, 0))),
            compiler_params=_compiler_params(("arbitrary",)),
        )(last_pos, tensor)

    # --------------------------------------------- streamed S reductions ---
    if mask is None:
        mask = jnp.ones((B, S), dtype=tensor.dtype)
    mask3 = mask.astype(tensor.dtype)[:, :, None]               # (B, S, 1)

    bt, st = _choose_tiles(B, S, H, itemsize=tensor.dtype.itemsize)
    grid = (B // bt, S // st)
    x_spec = pl.BlockSpec((bt, st, H), lambda b, s: (b, s, 0))
    m_spec = pl.BlockSpec((bt, st, 1), lambda b, s: (b, s, 0))
    o_spec = pl.BlockSpec((bt, H), lambda b, s: (b, 0))
    sem = ("parallel", "arbitrary")

    if mode == 'avg':
        return pl.pallas_call(
            _avg_kernel,
            out_shape=out_shape,
            grid_spec=pltpu.PrefetchScalarGridSpec(
                num_scalar_prefetch=0, grid=grid,
                in_specs=[x_spec, m_spec], out_specs=o_spec,
                scratch_shapes=[pltpu.VMEM((bt, H), jnp.float32),
                                pltpu.VMEM((bt, 1), jnp.float32)]),
            compiler_params=_compiler_params(sem),
        )(tensor, mask3)

    if mode == 'max':
        # TODO(synk): torch `tensor.max(1)` with mask=None returns
        # (values, indices); we return values only (matches the masked path).
        return pl.pallas_call(
            _max_kernel,
            out_shape=out_shape,
            grid_spec=pltpu.PrefetchScalarGridSpec(
                num_scalar_prefetch=0, grid=grid,
                in_specs=[x_spec, m_spec], out_specs=o_spec,
                scratch_shapes=[pltpu.VMEM((bt, H), jnp.float32)]),
            compiler_params=_compiler_params(sem),
        )(tensor, mask3)

    # ------------------------------------------------- attention pooling ---
    use_k = mode in ('attn_k', 'attn_kv')
    use_v = mode in ('attn_v', 'attn_kv')

    # Fused query vector: scores = q(K(x)) = x @ (wq @ Wk)^T + bk.wq ; the
    # constant bias term cancels in softmax, so the whole K matmul disappears.
    # For fixed weights this (1, H) vector can be cached outside the hot path.
    wq = params['wq'].astype(jnp.float32)                       # (1, H)
    q_eff = wq @ params['wk'].astype(jnp.float32) if use_k else wq

    inputs = [tensor, mask3, q_eff]
    in_specs = [x_spec, m_spec, pl.BlockSpec((1, H), lambda b, s: (0, 0))]
    if use_v:
        inputs += [params['wv'], params['bv']]
        in_specs += [pl.BlockSpec((H, H), lambda b, s: (0, 0)),
                     pl.BlockSpec((1, H), lambda b, s: (0, 0))]

    kern = functools.partial(_attn_kernel, use_v=use_v)
    return pl.pallas_call(
        kern,
        out_shape=out_shape,
        grid_spec=pltpu.PrefetchScalarGridSpec(
            num_scalar_prefetch=0, grid=grid,
            in_specs=in_specs, out_specs=o_spec,
            scratch_shapes=[pltpu.VMEM((bt, 1), jnp.float32),    # running max
                            pltpu.VMEM((bt, 1), jnp.float32),    # running denom
                            pltpu.VMEM((bt, H), jnp.float32)]),  # running numer
        compiler_params=_compiler_params(sem),
    )(*inputs)


# --------------------------------------------------------------- reference --

def _ref_forward(mode, x, mask, params):
    m = mask
    if mode == 'avg':
        mm = m[:, :, None]
        return jnp.sum(x * mm, 1) / jnp.maximum(jnp.sum(mm, 1), 1e-13)
    if mode == 'max':
        return jnp.max(jnp.where(m[:, :, None] > 0, x, _NEG_INF), axis=1)
    if mode == 'first':
        return x[:, 0, :]
    if mode == 'last':
        last_pos = jnp.sum(m, -1).astype(jnp.int32) - 1
        return x[jnp.arange(x.shape[0]), last_pos]
    k = v = x
    if mode in ('attn_k', 'attn_kv'):
        k = jnp.einsum('bsh,dh->bsd', k, params['wk']) + params['bk'][0]
    if mode in ('attn_v', 'attn_kv'):
        v = jnp.einsum('bsh,dh->bsd', v, params['wv']) + params['bv'][0]
    scores = jnp.einsum('bsh,h->bs', k, params['wq'][0])
    scores = jnp.where(m > 0, scores, _NEG_INF)
    w = jax.nn.softmax(scores, axis=-1)
    return jnp.einsum('bs,bsh->bh', w, v)


# -------------------------------------------------------------------- main --

if __name__ == "__main__":
    B, S, H = 2, 8, 32
    key = jax.random.PRNGKey(0)
    kx, kq, kk, kbk, kv, kbv = jax.random.split(key, 6)

    x = jax.random.normal(kx, (B, S, H), dtype=jnp.float32)
    lengths = jnp.array([S, 5], dtype=jnp.int32)
    mask = (jnp.arange(S)[None, :] < lengths[:, None]).astype(jnp.float32)

    bound = 1.0 / np.sqrt(H)   # deterministic init mimicking nn.Linear defaults
    params = {
        'wq': jax.random.uniform(kq,  (1, H), jnp.float32, -bound, bound),
        'wk': jax.random.uniform(kk,  (H, H), jnp.float32, -bound, bound),
        'bk': jax.random.uniform(kbk, (1, H), jnp.float32, -bound, bound),
        'wv': jax.random.uniform(kv,  (H, H), jnp.float32, -bound, bound),
        'bv': jax.random.uniform(kbv, (1, H), jnp.float32, -bound, bound),
    }

    ok = True
    for mode in POOLING_MODES:
        out = jax.block_until_ready(pooler_forward(mode, x, mask, params))
        ref = _ref_forward(mode, x, mask, params)
        good = out.shape == (B, H) and np.allclose(
            np.asarray(out), np.asarray(ref), atol=1e-4, rtol=1e-4)
        if not good:
            ok = False
            err = np.max(np.abs(np.asarray(out) - np.asarray(ref)))
            print(f"mode={mode}: mismatch, max abs err={err}")

    if ok:
        print("KERNEL_OK")
    else:
        raise SystemExit("pooler kernel mismatch vs JAX reference")
</pallas_src>

<mosaic_0001>
module attributes {stable_mosaic.version = 11 : i64} {
  func.func @_avg_kernel(%arg0: i32, %arg1: i32, %arg2: memref<2x8x32xf32, #tpu.memory_space<vmem>>, %arg3: memref<2x8x1xf32, #tpu.memory_space<vmem>>, %arg4: memref<2x32xf32, #tpu.memory_space<vmem>>, %arg5: memref<2x32xf32, #tpu.memory_space<vmem>>, %arg6: memref<2x1xf32, #tpu.memory_space<vmem>>) attributes {dimension_semantics = [#tpu.dimension_semantics<parallel>, #tpu.dimension_semantics<arbitrary>], iteration_bounds = array<i64: 1, 1>, scalar_prefetch = 0 : i64, scratch_operands = 2 : i64, tpu.core_type = #tpu.core_type<tc>, window_params = [{transform_indices = @transform_0, window_bounds = array<i64: 2, 8, 32>}, {transform_indices = @transform_1, window_bounds = array<i64: 2, 8, 1>}, {transform_indices = @transform_2, window_bounds = array<i64: 2, 32>}]} {
    %c0_i32 = arith.constant 0 : i32
    %0 = arith.cmpi eq, %arg1, %c0_i32 : i32
    %1 = arith.extui %0 : i1 to i32
    %c0_i32_0 = arith.constant 0 : i32
    %2 = arith.cmpi ne, %1, %c0_i32_0 : i32
    scf.if %2 {
      %cst_17 = arith.constant 0.000000e+00 : f32
      %18 = vector.broadcast %cst_17 : f32 to vector<2x32xf32>
      %c0_18 = arith.constant 0 : index
      %c0_19 = arith.constant 0 : index
      %19 = vector.load %arg5[%c0_18, %c0_19] : memref<2x32xf32, #tpu.memory_space<vmem>>, vector<2x32xf32>
      tpu.vector_store %arg5[%c0_18, %c0_19], %18 {strides = array<i32>} : memref<2x32xf32, #tpu.memory_space<vmem>>, vector<2x32xf32>,
      %cst_20 = arith.constant 0.000000e+00 : f32
      %20 = vector.broadcast %cst_20 : f32 to vector<2x1xf32>
      %c0_21 = arith.constant 0 : index
      %c0_22 = arith.constant 0 : index
      %21 = vector.load %arg6[%c0_21, %c0_22] : memref<2x1xf32, #tpu.memory_space<vmem>>, vector<2x1xf32>
      tpu.vector_store %arg6[%c0_21, %c0_22], %20 {strides = array<i32>} : memref<2x1xf32, #tpu.memory_space<vmem>>, vector<2x1xf32>,
    } else {
    }
    %c0 = arith.constant 0 : index
    %c0_1 = arith.constant 0 : index
    %c0_2 = arith.constant 0 : index
    %3 = vector.load %arg2[%c0, %c0_1, %c0_2] : memref<2x8x32xf32, #tpu.memory_space<vmem>>, vector<2x8x32xf32>
    %c0_3 = arith.constant 0 : index
    %c0_4 = arith.constant 0 : index
    %c0_5 = arith.constant 0 : index
    %4 = vector.load %arg3[%c0_3, %c0_4, %c0_5] : memref<2x8x1xf32, #tpu.memory_space<vmem>>, vector<2x8x1xf32>
    %c0_6 = arith.constant 0 : index
    %c0_7 = arith.constant 0 : index
    %5 = vector.load %arg5[%c0_6, %c0_7] : memref<2x32xf32, #tpu.memory_space<vmem>>, vector<2x32xf32>
    %6 = vector.broadcast %4 : vector<2x8x1xf32> to vector<2x8x32xf32>
    %7 = arith.mulf %3, %6 : vector<2x8x32xf32>
    %cst = arith.constant dense<0.000000e+00> : vector<2x32xf32>
    %8 = vector.multi_reduction <add>, %7, %cst [1] : vector<2x8x32xf32> to vector<2x32xf32>
    %9 = arith.addf %5, %8 : vector<2x32xf32>
    %c0_8 = arith.constant 0 : index
    %c0_9 = arith.constant 0 : index
    %10 = vector.load %arg5[%c0_8, %c0_9] : memref<2x32xf32, #tpu.memory_space<vmem>>, vector<2x32xf32>
    tpu.vector_store %arg5[%c0_8, %c0_9], %9 {strides = array<i32>} : memref<2x32xf32, #tpu.memory_space<vmem>>, vector<2x32xf32>,
    %c0_10 = arith.constant 0 : index
    %c0_11 = arith.constant 0 : index
    %11 = vector.load %arg6[%c0_10, %c0_11] : memref<2x1xf32, #tpu.memory_space<vmem>>, vector<2x1xf32>
    %cst_12 = arith.constant dense<0.000000e+00> : vector<2x1xf32>
    %12 = vector.multi_reduction <add>, %4, %cst_12 [1] : vector<2x8x1xf32> to vector<2x1xf32>
    %13 = arith.addf %11, %12 : vector<2x1xf32>
    %c0_13 = arith.constant 0 : index
    %c0_14 = arith.constant 0 : index
    %14 = vector.load %arg6[%c0_13, %c0_14] : memref<2x1xf32, #tpu.memory_space<vmem>>, vector<2x1xf32>
    tpu.vector_store %arg6[%c0_13, %c0_14], %13 {strides = array<i32>} : memref<2x1xf32, #tpu.memory_space<vmem>>, vector<2x1xf32>,
    %c0_i32_15 = arith.constant 0 : i32
    %15 = arith.cmpi eq, %arg1, %c0_i32_15 : i32
    %16 = arith.extui %15 : i1 to i32
    %c0_i32_16 = arith.constant 0 : i32
    %17 = arith.cmpi ne, %16, %c0_i32_16 : i32
    scf.if %17 {
      %c0_17 = arith.constant 0 : index
      %c0_18 = arith.constant 0 : index
      %18 = vector.load %arg5[%c0_17, %c0_18] : memref<2x32xf32, #tpu.memory_space<vmem>>, vector<2x32xf32>
      %c0_19 = arith.constant 0 : index
      %c0_20 = arith.constant 0 : index
      %19 = vector.load %arg6[%c0_19, %c0_20] : memref<2x1xf32, #tpu.memory_space<vmem>>, vector<2x1xf32>
      %cst_21 = arith.constant 9.99999982E-14 : f32
      %20 = vector.broadcast %cst_21 : f32 to vector<2x1xf32>
      %21 = arith.maximumf %19, %20 : vector<2x1xf32>
      %22 = vector.broadcast %21 : vector<2x1xf32> to vector<2x32xf32>
      %23 = arith.divf %18, %22 : vector<2x32xf32>
      %c0_22 = arith.constant 0 : index
      %c0_23 = arith.constant 0 : index
      %24 = vector.load %arg4[%c0_22, %c0_23] : memref<2x32xf32, #tpu.memory_space<vmem>>, vector<2x32xf32>
      tpu.vector_store %arg4[%c0_22, %c0_23], %23 {strides = array<i32>} : memref<2x32xf32, #tpu.memory_space<vmem>>, vector<2x32xf32>,
    } else {
    }
    return
  }
  func.func @transform_0(%arg0: i32, %arg1: i32) -> (i32, i32, i32) {
    %c0_i32 = arith.constant 0 : i32
    %c0_i32_0 = arith.constant 0 : i32
    return %arg0, %arg1, %c0_i32 : i32, i32, i32
  }
  func.func @transform_1(%arg0: i32, %arg1: i32) -> (i32, i32, i32) {
    %c0_i32 = arith.constant 0 : i32
    %c0_i32_0 = arith.constant 0 : i32
    return %arg0, %arg1, %c0_i32 : i32, i32, i32
  }
  func.func @transform_2(%arg0: i32, %arg1: i32) -> (i32, i32) {
    %c0_i32 = arith.constant 0 : i32
    %c0_i32_0 = arith.constant 0 : i32
    return %arg0, %c0_i32 : i32, i32
  }
}

</mosaic_0001>

<bundles_post_ra>
// kernel: tpu_custom_call.1
= control target key start
LH: loop header
LB: loop body
LE: loop exit
PB: predicated region body
PF: predicated region fallthrough
CT: control target
= control target key end

     0   :  { %vm61_vm0 = vcmask 7168   ;;  %v140_v2 = vmov 0   ;;  %vm18_vm1 = vcmask 1024   ;;  %v141_v7 = vmov 0.0   ;;  %s180_s0 = inlined_call_operand.vmem [shape: f32[2,8,32], index: 0, kind: input, shape index: {}]   ;;  %s181_s1 = inlined_call_operand.vmem [shape: f32[2,8,1], index: 1, kind: input, shape index: {}]   ;;  %s182_s2 = inlined_call_operand.hbm [shape: f32[2,32], index: 2, kind: output, shape index: {}]  }
   0x1   :  { %v22_v0 = vld [vmem:[%s181_s1] sm:$0xff]  ;;  %v23_v1 = vld [vmem:[%s181_s1 + $0x8] sm:$0xff]  ;;  %114 = vset.pattern.permute.xlu0 %v140_v2  ;;  %115 = vset.pattern.permute.xlu1 %v140_v2  ;;  %19 = vst.msk [vmem:[#allocation3] sm:$0x3] %vm18_vm1, %v141_v7 }
   0x2   :  { %v62_v3 = vsel %vm61_vm0, %v22_v0, 0.0  ;;  %v69_v4 = vsel %vm61_vm0, %v23_v1, 0.0  ;;  %27 = vperm.xlu0 %114, %v22_v0  }
   0x3   :  { %v63_v5 = vrot.slane %v62_v3, 4  ;;  %v70_v6 = vrot.slane %v69_v4, 4 }
   0x4   :  { %7 = vsyncpa [#allocation5], 0  ;;  %vm16_vm2 = vcmask 254976   ;;  %vm54_vm3 = vcmask 1041409   ;;  %v20_v23 = vld [vmem:[%s180_s0] sm:$0xff]  ;;  %vm37_vm4 = vcmask 261120  }
   0x5   :  { %v64_v8 = vadd.f32 %v63_v5, %v62_v3  ;;  %v71_v9 = vadd.f32 %v70_v6, %v69_v4  ;;  %17 = vst.msk [vmem:[#allocation2] sm:$0x3] %vm16_vm2, %v141_v7  ;;  %v21_v26 = vld [vmem:[%s180_s0 + $0x8] sm:$0xff]  ;;  %s142_s0 = smov [#allocation4]  }
   0x6   :  { %32 = vperm.xlu0 %114, %v23_v1   ;;  %s103_s16 = sshll.u32 %s142_s0, 4  ;;  %s104_s16 = int_to_ptr.vmem [resolvable:$true] %s103_s16 }
   0x7   :  { %v65_v10 = vrot.slane %v64_v8, 2  ;;  %v72_v11 = vrot.slane %v71_v9, 2  ;;  %s118_s17 = scalar_lea.vmem %s104_s16, 32  ;;  %p123_p1 = scmp.lt.s32.totalorder %s104_s16, %s104_s16 }
   0x8   :  { %v60_v18 = vld [vmem:[#allocation3] sm:$0x3]  ;;  %p119_p0 = scmp.ne.s32.totalorder %s104_s16, %s118_s17  ;;  %p124_p2 = scmp.lt.s32.totalorder %s118_s17, %s118_s17 }
   0x9   :  { %v66_v12 = vadd.f32 %v65_v10, %v64_v8  ;;  %v73_v13 = vadd.f32 %v72_v11, %v71_v9 }
   0xa   :  { %p125_p3 = por %p124_p2, %p123_p1 }
   0xb   :  { %v67_v14 = vrot.slane %v66_v12, 1  ;;  %v74_v15 = vrot.slane %v73_v13, 1 }
   0xc   :  { %v24_v43 = vld [vmem:[#allocation2] sm:$0x3]  ;;  %p126_p4 = pnand %p125_p3, %p119_p0 }
   0xd   :  { %v68_v16 = vadd.f32 %v67_v14, %v66_v12  ;;  %v75_v17 = vadd.f32 %v74_v15, %v73_v13 }
   0xf   :  { %v78_v19 = vsel %vm54_vm3, %v75_v17, %v68_v16 }
  0x10   :  { %v80_v20 = vadd.f32 %v78_v19, %v60_v18 }
  0x12   :  { %82 = vst.msk [vmem:[#allocation3] sm:$0x3] %vm18_vm1, %v80_v20 }
  0x19   :  { %v87_v21 = vld [vmem:[#allocation3] sm:$0x3] }
  0x1a   :  { %v88_v22 = vmax.f32 %v87_v21, 1e-13 }
  0x1c   :  { %91 = vperm.xlu1 %115, %v88_v22  }
  0x7d   :  { %v28_v24 = vpop.permute.xlu0 %27 }
  0x7e   :  { %v35_v25 = vmul.f32 %v28_v24, %v20_v23 }
  0x80   :  { %v38_v27 = vsel %vm37_vm4, %v35_v25, 0.0 }
  0x81   :  { %v39_v28 = vrot.slane %v38_v27, 4  ;;  %v33_v29 = vpop.permute.xlu0 %32 }
  0x82   :  { %v36_v30 = vmul.f32 %v33_v29, %v21_v26 }
  0x83   :  { %v40_v31 = vadd.f32 %v39_v28, %v38_v27 }
  0x84   :  { %v45_v32 = vsel %vm37_vm4, %v36_v30, 0.0 }
  0x85   :  { %v41_v33 = vrot.slane %v40_v31, 2  ;;  %v46_v34 = vrot.slane %v45_v32, 4 }
  0x87   :  { %v42_v35 = vadd.f32 %v41_v33, %v40_v31  ;;  %v47_v36 = vadd.f32 %v46_v34, %v45_v32 }
  0x89   :  { %v43_v37 = vrot.slane %v42_v35, 1  ;;  %v48_v38 = vrot.slane %v47_v36, 2 }
  0x8b   :  { %v49_v39 = vadd.f32 %v48_v38, %v47_v36  ;;  %v44_v40 = vadd.f32 %v43_v37, %v42_v35 }
  0x8d   :  { %v50_v41 = vrot.slane %v49_v39, 1 }
  0x8f   :  { %v51_v42 = vadd.f32 %v50_v41, %v49_v39 }
  0x91   :  { %v55_v44 = vsel %vm54_vm3, %v51_v42, %v44_v40 }
  0x92   :  { %v57_v45 = vadd.f32 %v55_v44, %v24_v43 }
  0x94   :  { %59 = vst.msk [vmem:[#allocation2] sm:$0x3] %vm16_vm2, %v57_v45 }
  0x97   :  { %v92_v46 = vpop.permute.xlu1 %91 }
  0x98   :  { %116 = vrcp.f32 %v92_v46 }
  0x9b   :  { %v86_v48 = vld [vmem:[#allocation2] sm:$0x3] }
  0xa5   :  { %v117_v47 = vpop.eup %116 }
  0xa6   :  { %v95_v49 = vmul.f32 %v117_v47, %v86_v48 }
  0xa8   :  { %96 = vst.msk [vmem:[#allocation4] sm:$0x3] %vm16_vm2, %v95_v49 }
  0xa9   :  { %129 = shalt.err (!%p126_p4)
}
  0xaa   :  { %106 = dma.vmem_to_hbm [thread:$0]  %s104_s16, 32, %s182_s2, [#allocation5]  }
  0xab   :  { %138 = dma.done.wait [#allocation5], 32  }
  0xac   :  { %139 = vsyncadd [#allocation5], 4294967264 }
  0xad   :  { %110 = vsyncpa [#allocation5], 1 }

</bundles_post_ra>
